<compile_context>
chip_gen: v5e
topology: v5e:2x2
jax: 0.10.0
libtpu: 0.0.40
codegen_flags: <defaults>
</compile_context>

<pallas_src>
import jax
import jax.numpy as jnp
from jax.experimental import pallas as pl
from jax.experimental.pallas import tpu as pltpu


def _make_kernel(HW, THW, Bt, ragged):
    inv_hw = 1.0 / float(HW)

    def kernel(x_ref, w1t_ref, w2t_ref, o_ref, sum_acc, max_acc):
        # x_ref: (Bt, C, THW); w1t: (C, Cr); w2t: (Cr, C); o_ref: (Bt, C)
        # sum_acc / max_acc: (Bt, C) f32 persistent scratch.
        hw = pl.program_id(1)

        @pl.when(hw == 0)
        def _init():
            sum_acc[...] = jnp.zeros_like(sum_acc)
            max_acc[...] = jnp.full_like(max_acc, -jnp.inf)

        # Upcast at load: bf16 ingest halves HBM traffic; f32 accumulation
        # keeps v5e (no bf16 VPU/EUP) happy and matches reference numerics.
        x = x_ref[...].astype(jnp.float32)                    # (Bt, C, THW)

        if ragged:
            # Last spatial tile may read past H*W; mask padded lanes.
            lane = jax.lax.broadcasted_iota(jnp.int32, x.shape, dimension=2)
            valid = (hw * THW + lane) < HW
            x_sum = jnp.where(valid, x, 0.0)
            x_max = jnp.where(valid, x, -jnp.inf)
        else:
            x_sum = x
            x_max = x

        # Per-tile lane reduce (XLU, separate slot from the VPU -> effectively
        # free at mem-bound) then accumulate into tiny (Bt, C) scratch.
        sum_acc[...] = sum_acc[...] + jnp.sum(x_sum, axis=-1)
        max_acc[...] = jnp.maximum(max_acc[...], jnp.max(x_max, axis=-1))

        @pl.when(hw == pl.num_programs(1) - 1)
        def _finalize():
            avg = sum_acc[...] * inv_hw                       # (Bt, C)
            mx = max_acc[...]                                 # (Bt, C)

            # Stack avg/max rows -> a single matmul per MLP layer.
            stacked = jnp.concatenate([avg, mx], axis=0)      # (2*Bt, C)
            h = jnp.maximum(
                jnp.dot(stacked, w1t_ref[...],
                        preferred_element_type=jnp.float32), 0.0)  # (2*Bt, Cr)
            o = jnp.dot(h, w2t_ref[...],
                        preferred_element_type=jnp.float32)        # (2*Bt, C)
            o_ref[...] = jax.nn.sigmoid(o[:Bt] + o[Bt:])           # (Bt, C)

    return kernel


def _choose_tiles(B, C, HW, itemsize, target_bytes=4 << 20):
    """Pick (Bt, THW) so each streamed x tile is ~<= 4 MiB."""
    per_image = C * HW * itemsize
    if per_image <= target_bytes:
        # Small feature map: keep full H*W, batch images per grid step to
        # amortize the ~0.35 us per-step overhead.
        thw = HW
        bt = 1
        for d in range(B, 0, -1):
            if B % d == 0 and d * per_image <= target_bytes:
                bt = d
                break
    else:
        # Large feature map: one image per step, tile H*W (lane dim must be a
        # multiple of 128 when it is not the full dim).
        bt = 1
        if HW >= 256:
            thw = min(HW, max(128, (target_bytes // (C * itemsize)) // 128 * 128))
        else:
            # TODO(synk): huge C with tiny HW would need channel tiling; for
            # now stream the whole map in one tile.
            thw = HW
    n_hw = -(-HW // thw)
    return bt, thw, n_hw


def channel_attention(x, w1, w2):
    """x: (B, C, H, W) f32 or bf16; w1: (Cr, C) fc1 weight; w2: (C, Cr) fc2 weight.
    Returns (B, C, 1, 1) sigmoid attention weights, matching the PyTorch module."""
    B, C, H, W = x.shape
    Cr = w1.shape[0]
    HW = H * W

    x_flat = x.reshape(B, C, HW)                             # keep input dtype
    w1t = jnp.asarray(w1, jnp.float32).T                     # (C, Cr)
    w2t = jnp.asarray(w2, jnp.float32).T                     # (Cr, C)

    bt, thw, n_hw = _choose_tiles(B, C, HW, x_flat.dtype.itemsize)
    ragged = (HW % thw) != 0

    kernel = _make_kernel(HW, thw, bt, ragged)

    out = pl.pallas_call(
        kernel,
        out_shape=jax.ShapeDtypeStruct((B, C), jnp.float32),
        grid_spec=pltpu.PrefetchScalarGridSpec(
            num_scalar_prefetch=0,
            grid=(B // bt, n_hw),
            in_specs=[
                pl.BlockSpec((bt, C, thw), lambda b, h: (b, 0, h)),
                pl.BlockSpec((C, Cr), lambda b, h: (0, 0)),
                pl.BlockSpec((Cr, C), lambda b, h: (0, 0)),
            ],
            out_specs=pl.BlockSpec((bt, C), lambda b, h: (b, 0)),
            scratch_shapes=[
                pltpu.VMEM((bt, C), jnp.float32),   # running sum (per channel)
                pltpu.VMEM((bt, C), jnp.float32),   # running max (per channel)
            ],
        ),
        compiler_params=pltpu.CompilerParams(
            dimension_semantics=("parallel", "arbitrary")),
    )(x_flat, w1t, w2t)

    return out.reshape(B, C, 1, 1)


def channel_attention_ref(x, w1, w2):
    # Pure-JAX reference mirroring the PyTorch forward.
    xf = x.astype(jnp.float32)
    avg = jnp.mean(xf, axis=(2, 3))                          # (B, C)
    mx = jnp.max(xf, axis=(2, 3))                            # (B, C)

    def mlp(p):
        h = jnp.maximum(p @ w1.T, 0.0)                       # (B, Cr)
        return h @ w2.T                                      # (B, C)

    out = jax.nn.sigmoid(mlp(avg) + mlp(mx))
    return out.reshape(*out.shape, 1, 1)


if __name__ == "__main__":
    B, C, H, W = 2, 16, 16, 16
    ratio = 4
    Cr = C // ratio

    key = jax.random.PRNGKey(0)
    kx, k1, k2 = jax.random.split(key, 3)

    x = jax.random.normal(kx, (B, C, H, W), dtype=jnp.float32)
    # fc1: Conv2d(C, C//ratio, 1, bias=False) -> weight (Cr, C); fc2 -> (C, Cr)
    w1 = jax.random.normal(k1, (Cr, C), dtype=jnp.float32) * (1.0 / jnp.sqrt(C))
    w2 = jax.random.normal(k2, (C, Cr), dtype=jnp.float32) * (1.0 / jnp.sqrt(Cr))

    out = channel_attention(x, w1, w2)
    out = jax.block_until_ready(out)

    ref = channel_attention_ref(x, w1, w2)
    assert out.shape == (B, C, 1, 1)
    assert jnp.allclose(out, ref, rtol=1e-4, atol=1e-5), "mismatch vs reference"

    print("KERNEL_OK")
</pallas_src>

<mosaic_0001>
module attributes {stable_mosaic.version = 11 : i64} {
  func.func @kernel(%arg0: i32, %arg1: i32, %arg2: memref<2x16x256xf32, #tpu.memory_space<vmem>>, %arg3: memref<16x4xf32, #tpu.memory_space<vmem>>, %arg4: memref<4x16xf32, #tpu.memory_space<vmem>>, %arg5: memref<2x16xf32, #tpu.memory_space<vmem>>, %arg6: memref<2x16xf32, #tpu.memory_space<vmem>>, %arg7: memref<2x16xf32, #tpu.memory_space<vmem>>) attributes {dimension_semantics = [#tpu.dimension_semantics<parallel>, #tpu.dimension_semantics<arbitrary>], iteration_bounds = array<i64: 1, 1>, scalar_prefetch = 0 : i64, scratch_operands = 2 : i64, tpu.core_type = #tpu.core_type<tc>, window_params = [{transform_indices = @transform_0, window_bounds = array<i64: 2, 16, 256>}, {pipeline_mode = #tpu.pipeline_mode<synchronous>, transform_indices = @transform_1, window_bounds = array<i64: 16, 4>}, {pipeline_mode = #tpu.pipeline_mode<synchronous>, transform_indices = @transform_2, window_bounds = array<i64: 4, 16>}, {transform_indices = @transform_3, window_bounds = array<i64: 2, 16>}]} {
    %c0_i32 = arith.constant 0 : i32
    %0 = arith.cmpi eq, %arg1, %c0_i32 : i32
    %1 = arith.extui %0 : i1 to i32
    %c0_i32_0 = arith.constant 0 : i32
    %2 = arith.cmpi ne, %1, %c0_i32_0 : i32
    scf.if %2 {
      %cst_14 = arith.constant 0.000000e+00 : f32
      %15 = vector.broadcast %cst_14 : f32 to vector<2x16xf32>
      %c0_15 = arith.constant 0 : index
      %c0_16 = arith.constant 0 : index
      %16 = vector.load %arg6[%c0_15, %c0_16] : memref<2x16xf32, #tpu.memory_space<vmem>>, vector<2x16xf32>
      tpu.vector_store %arg6[%c0_15, %c0_16], %15 {strides = array<i32>} : memref<2x16xf32, #tpu.memory_space<vmem>>, vector<2x16xf32>,
      %cst_17 = arith.constant 0xFF800000 : f32
      %17 = vector.broadcast %cst_17 : f32 to vector<2x16xf32>
      %c0_18 = arith.constant 0 : index
      %c0_19 = arith.constant 0 : index
      %18 = vector.load %arg7[%c0_18, %c0_19] : memref<2x16xf32, #tpu.memory_space<vmem>>, vector<2x16xf32>
      tpu.vector_store %arg7[%c0_18, %c0_19], %17 {strides = array<i32>} : memref<2x16xf32, #tpu.memory_space<vmem>>, vector<2x16xf32>,
    } else {
    }
    %c0 = arith.constant 0 : index
    %c0_1 = arith.constant 0 : index
    %c0_2 = arith.constant 0 : index
    %3 = vector.load %arg2[%c0, %c0_1, %c0_2] : memref<2x16x256xf32, #tpu.memory_space<vmem>>, vector<2x16x256xf32>
    %c0_3 = arith.constant 0 : index
    %c0_4 = arith.constant 0 : index
    %4 = vector.load %arg6[%c0_3, %c0_4] : memref<2x16xf32, #tpu.memory_space<vmem>>, vector<2x16xf32>
    %cst = arith.constant dense<0.000000e+00> : vector<2x16xf32>
    %5 = vector.multi_reduction <add>, %3, %cst [2] : vector<2x16x256xf32> to vector<2x16xf32>
    %6 = arith.addf %4, %5 : vector<2x16xf32>
    %c0_5 = arith.constant 0 : index
    %c0_6 = arith.constant 0 : index
    %7 = vector.load %arg6[%c0_5, %c0_6] : memref<2x16xf32, #tpu.memory_space<vmem>>, vector<2x16xf32>
    tpu.vector_store %arg6[%c0_5, %c0_6], %6 {strides = array<i32>} : memref<2x16xf32, #tpu.memory_space<vmem>>, vector<2x16xf32>,
    %c0_7 = arith.constant 0 : index
    %c0_8 = arith.constant 0 : index
    %8 = vector.load %arg7[%c0_7, %c0_8] : memref<2x16xf32, #tpu.memory_space<vmem>>, vector<2x16xf32>
    %cst_9 = arith.constant dense<0xFF800000> : vector<2x16xf32>
    %9 = vector.multi_reduction <maximumf>, %3, %cst_9 [2] : vector<2x16x256xf32> to vector<2x16xf32>
    %10 = arith.maximumf %8, %9 : vector<2x16xf32>
    %c0_10 = arith.constant 0 : index
    %c0_11 = arith.constant 0 : index
    %11 = vector.load %arg7[%c0_10, %c0_11] : memref<2x16xf32, #tpu.memory_space<vmem>>, vector<2x16xf32>
    tpu.vector_store %arg7[%c0_10, %c0_11], %10 {strides = array<i32>} : memref<2x16xf32, #tpu.memory_space<vmem>>, vector<2x16xf32>,
    %c0_i32_12 = arith.constant 0 : i32
    %12 = arith.cmpi eq, %arg1, %c0_i32_12 : i32
    %13 = arith.extui %12 : i1 to i32
    %c0_i32_13 = arith.constant 0 : i32
    %14 = arith.cmpi ne, %13, %c0_i32_13 : i32
    scf.if %14 {
      %c0_14 = arith.constant 0 : index
      %c0_15 = arith.constant 0 : index
      %15 = vector.load %arg6[%c0_14, %c0_15] : memref<2x16xf32, #tpu.memory_space<vmem>>, vector<2x16xf32>
      %cst_16 = arith.constant 3.906250e-03 : f32
      %16 = vector.broadcast %cst_16 : f32 to vector<2x16xf32>
      %17 = arith.mulf %15, %16 : vector<2x16xf32>
      %c0_17 = arith.constant 0 : index
      %c0_18 = arith.constant 0 : index
      %18 = vector.load %arg7[%c0_17, %c0_18] : memref<2x16xf32, #tpu.memory_space<vmem>>, vector<2x16xf32>
      %19 = tpu.concatenate %17, %18 in 0 : vector<2x16xf32>, vector<2x16xf32> -> vector<4x16xf32>
      %c0_19 = arith.constant 0 : index
      %c0_20 = arith.constant 0 : index
      %20 = vector.load %arg3[%c0_19, %c0_20] : memref<16x4xf32, #tpu.memory_space<vmem>>, vector<16x4xf32>
      %cst_21 = arith.constant dense<0.000000e+00> : vector<4x4xf32>
      %21 = tpu.matmul %19, %20, %cst_21 {dimension_numbers = #tpu.dot_dimension_numbers<[1], [0], [0], [1], [0, 0, 1, 1], [], []>} : vector<4x16xf32>, vector<16x4xf32>, vector<4x4xf32> -> vector<4x4xf32>
      %cst_22 = arith.constant 0.000000e+00 : f32
      %22 = vector.broadcast %cst_22 : f32 to vector<4x4xf32>
      %23 = arith.maximumf %21, %22 : vector<4x4xf32>
      %c0_23 = arith.constant 0 : index
      %c0_24 = arith.constant 0 : index
      %24 = vector.load %arg4[%c0_23, %c0_24] : memref<4x16xf32, #tpu.memory_space<vmem>>, vector<4x16xf32>
      %cst_25 = arith.constant dense<0.000000e+00> : vector<4x16xf32>
      %25 = tpu.matmul %23, %24, %cst_25 {dimension_numbers = #tpu.dot_dimension_numbers<[1], [0], [0], [1], [0, 0, 1, 1], [], []>} : vector<4x4xf32>, vector<4x16xf32>, vector<4x16xf32> -> vector<4x16xf32>
      %26 = vector.extract_strided_slice %25 {offsets = [0, 0], sizes = [2, 16], strides = [1, 1]} : vector<4x16xf32> to vector<2x16xf32>
      %27 = vector.extract_strided_slice %25 {offsets = [2, 0], sizes = [2, 16], strides = [1, 1]} : vector<4x16xf32> to vector<2x16xf32>
      %28 = arith.addf %26, %27 : vector<2x16xf32>
      %29 = arith.negf %28 : vector<2x16xf32>
      %30 = math.exp %29 : vector<2x16xf32>
      %cst_26 = arith.constant 1.000000e+00 : f32
      %31 = vector.broadcast %cst_26 : f32 to vector<2x16xf32>
      %32 = arith.addf %31, %30 : vector<2x16xf32>
      %33 = arith.divf %31, %32 : vector<2x16xf32>
      %c0_27 = arith.constant 0 : index
      %c0_28 = arith.constant 0 : index
      %34 = vector.load %arg5[%c0_27, %c0_28] : memref<2x16xf32, #tpu.memory_space<vmem>>, vector<2x16xf32>
      tpu.vector_store %arg5[%c0_27, %c0_28], %33 {strides = array<i32>} : memref<2x16xf32, #tpu.memory_space<vmem>>, vector<2x16xf32>,
    } else {
    }
    return
  }
  func.func @transform_0(%arg0: i32, %arg1: i32) -> (i32, i32, i32) {
    %c0_i32 = arith.constant 0 : i32
    %c0_i32_0 = arith.constant 0 : i32
    return %arg0, %c0_i32, %arg1 : i32, i32, i32
  }
  func.func @transform_1(%arg0: i32, %arg1: i32) -> (i32, i32) {
    %c0_i32 = arith.constant 0 : i32
    %c0_i32_0 = arith.constant 0 : i32
    %c0_i32_1 = arith.constant 0 : i32
    return %c0_i32, %c0_i32_0 : i32, i32
  }
  func.func @transform_2(%arg0: i32, %arg1: i32) -> (i32, i32) {
    %c0_i32 = arith.constant 0 : i32
    %c0_i32_0 = arith.constant 0 : i32
    %c0_i32_1 = arith.constant 0 : i32
    return %c0_i32, %c0_i32_0 : i32, i32
  }
  func.func @transform_3(%arg0: i32, %arg1: i32) -> (i32, i32) {
    %c0_i32 = arith.constant 0 : i32
    %c0_i32_0 = arith.constant 0 : i32
    return %arg0, %c0_i32 : i32, i32
  }
}

</mosaic_0001>

<bundles_post_ra>
// kernel: tpu_custom_call.1
= control target key start
LH: loop header
LB: loop body
LE: loop exit
PB: predicated region body
PF: predicated region fallthrough
CT: control target
= control target key end

     0   :  { %8 = vsyncpa [#allocation5], 0  ;;  %s332_s0 = inlined_call_operand.hbm [shape: f32[2,16,256], index: 0, kind: input, shape index: {}]   ;;  %s333_s1 = inlined_call_operand.vmem [shape: f32[16,4], index: 1, kind: input, shape index: {}]   ;;  %s334_s2 = inlined_call_operand.vmem [shape: f32[4,16], index: 2, kind: input, shape index: {}]   ;;  %s335_s3 = inlined_call_operand.hbm [shape: f32[2,16], index: 3, kind: output, shape index: {}]  }
   0x1   :  { %9 = vsyncpa [#allocation6], 0  ;;  %s14_s14 = sshll.u32 %s332_s0, 4  ;;  %s280_s15 = smov [#allocation4]   ;;  %s15_s14 = int_to_ptr.hbm [resolvable:$true] %s14_s14 }
   0x2   :  { %s16_s16 = sshll.u32 %s280_s15, 4  ;;  %s281_s17 = smov 256   ;;  %s17_s16 = int_to_ptr.vmem [resolvable:$true] %s16_s16 }
   0x3   :  { %s282_s18 = smov 16  }
   0x4   :  { %22 = dma.hbm_to_vmem [thread:$0]  %s15_s14, 1024, %s17_s16, [#allocation5], %s281_s17, %s281_s17, %s282_s18  }
   0x5   :  { %276 = dma.done.wait [#allocation5], 1024  }
   0x6   :  { %277 = vsyncadd [#allocation5], 4294966272  ;;  %v42_v0 = vld [vmem:[#allocation4 + $0x20] sm:$0xff]  ;;  %v43_v1 = vld [vmem:[#allocation4 + $0x28] sm:$0xff]  ;;  %vm35_vm0 = vcmask 123904   ;;  %v283_v16 = vmov 0.0   ;;  %v63_v20 = vlaneseq }
   0x7   :  { %v38_v2 = vld [vmem:[#allocation4] sm:$0xff]  ;;  %v53_v3 = vadd.f32 %v43_v1, %v42_v0  ;;  %v39_v4 = vld [vmem:[#allocation4 + $0x8] sm:$0xff]  ;;  %v44_v7 = vld [vmem:[#allocation4 + $0x30] sm:$0xff]  ;;  %v86_v15 = vmax.f32 %v42_v0, %v43_v1  ;;  %36 = vst.msk [vmem:[#allocation2] sm:$0x3] %vm35_vm0, %v283_v16  ;;  %v284_v17 = vmov -inf  }
   0x8   :  { %v80_v5 = vmax.f32 %v38_v2, %v39_v4  ;;  %v47_v6 = vadd.f32 %v39_v4, %v38_v2  ;;  %v45_v8 = vld [vmem:[#allocation4 + $0x38] sm:$0xff]  ;;  %v40_v9 = vld [vmem:[#allocation4 + $0x10] sm:$0xff]  ;;  %37 = vst.msk [vmem:[#allocation3] sm:$0x3] %vm35_vm0, %v284_v17  ;;  %v118_v18 = vld [vmem:[%s333_s1 + $0x8] sm:$0xff]  ;;  %v64_v23 = vand.u32 127, %v63_v20 }
   0x9   :  { %54 = vadd.xlane.f32.xlu1 %v53_v3  ;;  %v41_v10 = vld [vmem:[#allocation4 + $0x18] sm:$0xff]  ;;  %v56_v11 = vadd.f32 %v45_v8, %v44_v7  ;;  %v89_v14 = vmax.f32 %v44_v7, %v45_v8  ;;  %137 = vmatpush.msra.mxu0 %v118_v18  ;;  %vm68_vm1 = vcmask 130112   ;;  %vm73_vm2 = vcmask 1041409   ;;  %s204_s26 = sshll.u32 %s335_s3, 4  ;;  %s205_s26 = int_to_ptr.hbm [resolvable:$true] %s204_s26 }
   0xa   :  { %81 = vmax.xlane.f32.xlu2 %v80_v5  ;;  %48 = vadd.xlane.f32.xlu0 %v47_v6  ;;  %v83_v12 = vmax.f32 %v40_v9, %v41_v10  ;;  %v50_v13 = vadd.f32 %v41_v10, %v40_v9  ;;  %v117_v19 = vld [vmem:[%s333_s1] sm:$0xff]  ;;  %v66_v25 = vadd.s32 4294967288, %v64_v23  ;;  %vm115_vm3 = vcmask 1041408  }
   0xb   :  { %138 = vmatpush.msra.mxu0 %v117_v19  ;;  %vm119_vm4 = vcmask 130048   ;;  %v144_v54 = vld [vmem:[%s334_s2] sm:$0xf]  ;;  %vm149_vm5 = vcmask 1043456   ;;  %vm145_vm6 = vcmask 31744   ;;  %s285_s2 = smov [#allocation7]  }
   0xc   :  { %215 = vmatpush.msk.msra.mxu1 %vm149_vm5, %v144_v54  ;;  %s202_s23 = sshll.u32 %s285_s2, 4  ;;  %s203_s23 = int_to_ptr.vmem [resolvable:$true] %s202_s23 }
   0xe   :  { %v46_v33 = vld [vmem:[#allocation2] sm:$0x3] }
   0xf   :  { %v79_v44 = vld [vmem:[#allocation3] sm:$0x3] }
  0x11   :  { %57 = vadd.xlane.f32.xlu1 %v56_v11 }
  0x12   :  { %84 = vmax.xlane.f32.xlu2 %v83_v12  ;;  %51 = vadd.xlane.f32.xlu0 %v50_v13 }
  0x19   :  { %90 = vmax.xlane.f32.xlu1 %v89_v14 }
  0x1a   :  { %87 = vmax.xlane.f32.xlu0 %v86_v15 }
  0x7c   :  { %v55_v21 = vpop.xlane.xlu1 %54 }
  0x7d   :  { %v49_v22 = vpop.xlane.xlu0 %48  ;;  %v82_v24 = vpop.xlane.xlu2 %81  ;;  %v70_v27 = vperm.slane %v55_v21, %v64_v23 }
  0x7e   :  { %v65_v30 = vperm.slane %v49_v22, %v64_v23  ;;  %v96_v38 = vperm.slane %v82_v24, %v64_v23 }
  0x84   :  { %v58_v26 = vpop.xlane.xlu1 %57 }
  0x85   :  { %v71_v28 = vperm.slane %v58_v26, %v66_v25  ;;  %v52_v29 = vpop.xlane.xlu0 %51  ;;  %v85_v35 = vpop.xlane.xlu2 %84 }
  0x86   :  { %v67_v31 = vperm.slane %v52_v29, %v66_v25  ;;  %v97_v39 = vperm.slane %v85_v35, %v66_v25 }
  0x87   :  { %v72_v32 = vsel %vm68_vm1, %v71_v28, %v70_v27 }
  0x88   :  { %v69_v34 = vsel %vm68_vm1, %v67_v31, %v65_v30  ;;  %v98_v45 = vsel %vm68_vm1, %v97_v39, %v96_v38 }
  0x89   :  { %v74_v36 = vsel %vm73_vm2, %v72_v32, %v69_v34 }
  0x8a   :  { %v76_v37 = vadd.f32 %v74_v36, %v46_v33 }
  0x8c   :  { %78 = vst.msk [vmem:[#allocation2] sm:$0x3] %vm35_vm0, %v76_v37  ;;  %v91_v40 = vpop.xlane.xlu1 %90 }
  0x8d   :  { %v100_v41 = vperm.slane %v91_v40, %v66_v25  ;;  %v88_v42 = vpop.xlane.xlu0 %87 }
  0x8e   :  { %v99_v43 = vperm.slane %v88_v42, %v64_v23 }
  0x90   :  { %v101_v46 = vsel %vm68_vm1, %v100_v41, %v99_v43 }
  0x91   :  { %v102_v47 = vsel %vm73_vm2, %v101_v46, %v98_v45 }
  0x92   :  { %v104_v48 = vmax.f32 %v79_v44, %v102_v47 }
  0x93   :  { %v109_v49 = vld [vmem:[#allocation2] sm:$0x3] }
  0x94   :  { %105 = vst.msk [vmem:[#allocation3] sm:$0x3] %vm35_vm0, %v104_v48  ;;  %v110_v51 = vmul.f32 0.00390625, %v109_v49 }
  0x9b   :  { %v111_v50 = vld [vmem:[#allocation3] sm:$0x3] }
  0x9c   :  { %v113_v52 = vrot.slane %v111_v50, 6 }
  0x9e   :  { %v116_v53 = vsel %vm115_vm3, %v110_v51, %v113_v52 }
  0x9f   :  { %214 = vmatmul.msk.f32.vlgmr.msra.gmra.mxu0 %vm119_vm4, %v116_v53 }
 0x11c   :  { %v140_v55 = vpop.f32.mrf.mxu0 }
 0x11d   :  { %v143_v56 = vmax.f32 %v140_v55, 0.0 }
 0x11f   :  { %216 = vmatmul.msk.f32.vlgmr.msra.gmra.mxu1 %vm145_vm6, %v143_v56 }
 0x19c   :  { %v170_v57 = vpop.f32.mrf.mxu1 }
 0x19d   :  { %v174_v58 = vrot.slane %v170_v57, 2 }
 0x19f   :  { %v176_v59 = vadd.f32 %v174_v58, %v170_v57 }
 0x1a1   :  { %v217_v60 = vmul.f32 -1.442695, %v176_v59 }
 0x1a3   :  { %224 = vpow2.f32 %v217_v60 }
 0x1a9   :  { %v225_v61 = vpop.eup %224 }
 0x1aa   :  { %v180_v62 = vadd.f32 1.0, %v225_v61 }
 0x1ac   :  { %226 = vrcp.f32 %v180_v62  ;;  %v192_v2 = vand.u32 2147483648, %v180_v62  ;;  %v190_v4 = vand.u32 2147483647, %v180_v62  ;;  %vm186_vm8 = vweird.f32 %v180_v62 }
 0x1ae   :  { %v193_v6 = vor.u32 1.1754944e-38, %v192_v2  ;;  %vm191_vm10 = vcmp.eq.f32.partialorder %v190_v4, 8.507059e+37 }
 0x1b2   :  { %v227_v63 = vpop.eup %226 }
 0x1b3   :  { %v182_v0 = vmul.f32 %v227_v63, %v180_v62  ;;  %vm187_vm7 = vweird.f32 %v227_v63 }
 0x1b4   :  { %vm188_vm9 = vmor %vm186_vm8, %vm187_vm7 }
 0x1b5   :  { %v183_v1 = vsub.f32 1.0, %v182_v0 }
 0x1b7   :  { %v184_v3 = vmul.f32 %v227_v63, %v183_v1 }
 0x1b9   :  { %v185_v5 = vadd.f32 %v227_v63, %v184_v3 }
 0x1bb   :  { %v189_v7 = vsel %vm188_vm9, %v227_v63, %v185_v5 }
 0x1bc   :  { %v194_v8 = vsel %vm191_vm10, %v193_v6, %v189_v7 }
 0x1bd   :  { %196 = vst.msk [vmem:[#allocation7] sm:$0x3] %vm35_vm0, %v194_v8 }
 0x1be   :  { %207 = dma.vmem_to_hbm [thread:$0]  %s203_s23, 32, %s205_s26, [#allocation6]  }
 0x1bf   :  { %278 = dma.done.wait [#allocation6], 32  }
 0x1c0   :  { %279 = vsyncadd [#allocation6], 4294967264 }
 0x1c1   :  { %212 = vsyncpa [#allocation5], 1 }
 0x1c2   :  { %213 = vsyncpa [#allocation6], 1 }

</bundles_post_ra>
